<compile_context>
chip_gen: v6e
topology: v6e:2x2x1
jax: 0.10.0
libtpu: 0.0.40
codegen_flags: <defaults>
</compile_context>

<pallas_src>
import jax
import jax.numpy as jnp
from jax.experimental import pallas as pl
from jax.experimental.pallas import tpu as pltpu


_VMEM_LIMIT_BYTES = 48 * 1024 * 1024   # above 32 MiB default scoped limit, below v7x 64 MiB
_VMEM_BUDGET_BYTES = 40 * 1024 * 1024  # headroom under the limit for compiler scratch


def _round_up(x, m):
    return (x + m - 1) // m * m


def _pick_tile_rows(rows, patch_dim_p, feature_dim_p, embed_dim_p,
                    budget_bytes=_VMEM_BUDGET_BYTES):
    """Largest 8-aligned row tile whose double-buffered working set fits VMEM."""
    # Weights (bf16) + biases (f32); pipeline double-buffers them even though
    # their block index never changes (fetched only once).
    weight_bytes = 2 * 2 * (patch_dim_p * feature_dim_p + feature_dim_p * embed_dim_p)
    weight_bytes += 2 * 4 * (feature_dim_p + embed_dim_p)
    tr = 8
    for cand in (512, 384, 256, 128, 64, 32, 16, 8):
        io_bytes = 2 * cand * patch_dim_p * 2 + 2 * cand * embed_dim_p * 4  # dbl-buffered in/out
        live_bytes = cand * (feature_dim_p + embed_dim_p) * 4               # f32 intermediates
        if weight_bytes + io_bytes + live_bytes <= budget_bytes:
            tr = cand
            break
    if rows < tr:                       # small problems: one tile covering all rows
        tr = max(8, _round_up(rows, 8))
    return tr


def hybrid_embed_kernel(patches_ref, wb_ref, bb_ref, wp_ref, bp_ref, out_ref):
    """feat = relu(patches @ Wb + bb); out = feat @ Wp + bp  (lane-padded dims).

    patches_ref: (TILE_ROWS, patch_dim_p)     bf16
    wb_ref:      (patch_dim_p, feature_dim_p) bf16   backbone conv weight as matmul
    bb_ref:      (1, feature_dim_p)           f32    backbone conv bias
    wp_ref:      (feature_dim_p, embed_dim_p) bf16   1x1 proj conv weight as matmul
    bp_ref:      (1, embed_dim_p)             f32    proj bias
    out_ref:     (TILE_ROWS, embed_dim_p)     f32
    """
    feat = jnp.dot(patches_ref[...], wb_ref[...],
                   preferred_element_type=jnp.float32)
    feat = jnp.maximum(feat + bb_ref[...], 0.0)            # bias + ReLU in f32 (v5e-safe)
    out = jnp.dot(feat.astype(jnp.bfloat16), wp_ref[...],
                  preferred_element_type=jnp.float32)
    out_ref[...] = (out + bp_ref[...]).astype(out_ref.dtype)


def prepare_hybrid_embed_params(wb, bb, wp, bp, *, patch, in_chans):
    """One-time (model init) weight relayout: PyTorch conv weights -> padded bf16 matmul weights."""
    feature_dim = wb.shape[0]            # wb: (feature_dim, C, p, p)
    embed_dim = wp.shape[0]              # wp: (embed_dim, feature_dim, 1, 1)
    patch_dim = patch * patch * in_chans

    patch_dim_p = _round_up(patch_dim, 128)
    feature_dim_p = _round_up(feature_dim, 128)
    embed_dim_p = _round_up(embed_dim, 128)

    wb_mat = jnp.transpose(wb, (2, 3, 1, 0)).reshape(patch_dim, feature_dim)
    wb_mat = jnp.pad(wb_mat, ((0, patch_dim_p - patch_dim),
                              (0, feature_dim_p - feature_dim)))
    bb_row = jnp.pad(bb.reshape(1, feature_dim),
                     ((0, 0), (0, feature_dim_p - feature_dim)))
    wp_mat = jnp.transpose(wp[:, :, 0, 0], (1, 0))            # (feature_dim, embed_dim)
    wp_mat = jnp.pad(wp_mat, ((0, feature_dim_p - feature_dim),
                              (0, embed_dim_p - embed_dim)))
    bp_row = jnp.pad(bp.reshape(1, embed_dim),
                     ((0, 0), (0, embed_dim_p - embed_dim)))

    return dict(
        wb_mat=wb_mat.astype(jnp.bfloat16),
        bb_row=bb_row.astype(jnp.float32),
        wp_mat=wp_mat.astype(jnp.bfloat16),
        bp_row=bp_row.astype(jnp.float32),
        patch=patch, in_chans=in_chans,
        patch_dim=patch_dim, feature_dim=feature_dim, embed_dim=embed_dim,
        patch_dim_p=patch_dim_p, feature_dim_p=feature_dim_p, embed_dim_p=embed_dim_p,
    )


def hybrid_embed(x_nchw, params):
    """x_nchw: (B, C, H, W) float32. Returns (B, num_patches, embed_dim) float32."""
    p = params["patch"]
    B, C, H, W = x_nchw.shape
    assert C == params["in_chans"] and H % p == 0 and W % p == 0
    Hp, Wp_ = H // p, W // p
    num_patches = Hp * Wp_
    rows = B * num_patches

    patch_dim = params["patch_dim"]
    patch_dim_p = params["patch_dim_p"]
    feature_dim_p = params["feature_dim_p"]
    embed_dim = params["embed_dim"]
    embed_dim_p = params["embed_dim_p"]

    # Patch extraction: one fused XLA relayout pass (transpose+reshape+bf16 cast+pad).
    # TODO(synk): fold this relayout into the kernel's own DMA (strip BlockSpec over
    # (B, Hp) with an in-kernel patch unroll) to remove this extra HBM round-trip.
    x_nhwc = jnp.transpose(x_nchw, (0, 2, 3, 1))                         # (B,H,W,C)
    patches = x_nhwc.reshape(B, Hp, p, Wp_, p, C)
    patches = jnp.transpose(patches, (0, 1, 3, 2, 4, 5))                 # (B,Hp,Wp,p,p,C)
    patches = patches.reshape(rows, patch_dim).astype(jnp.bfloat16)

    tile_rows = _pick_tile_rows(rows, patch_dim_p, feature_dim_p, embed_dim_p)
    rows_p = _round_up(rows, tile_rows)
    patches = jnp.pad(patches, ((0, rows_p - rows), (0, patch_dim_p - patch_dim)))

    grid = (rows_p // tile_rows,)

    flops = 2 * rows_p * (patch_dim_p * feature_dim_p + feature_dim_p * embed_dim_p)
    bytes_accessed = (
        rows_p * patch_dim_p * 2                    # patches (bf16), streamed
        + patch_dim_p * feature_dim_p * 2           # backbone weight (fetched once)
        + feature_dim_p * embed_dim_p * 2           # proj weight (fetched once)
        + rows_p * embed_dim_p * 4                  # f32 output
    )

    out_flat = pl.pallas_call(
        hybrid_embed_kernel,
        out_shape=jax.ShapeDtypeStruct((rows_p, embed_dim_p), jnp.float32),
        grid_spec=pltpu.PrefetchScalarGridSpec(
            num_scalar_prefetch=0,
            grid=grid,
            in_specs=[
                pl.BlockSpec((tile_rows, patch_dim_p), lambda i: (i, 0)),
                pl.BlockSpec((patch_dim_p, feature_dim_p), lambda i: (0, 0)),
                pl.BlockSpec((1, feature_dim_p), lambda i: (0, 0)),
                pl.BlockSpec((feature_dim_p, embed_dim_p), lambda i: (0, 0)),
                pl.BlockSpec((1, embed_dim_p), lambda i: (0, 0)),
            ],
            out_specs=pl.BlockSpec((tile_rows, embed_dim_p), lambda i: (i, 0)),
        ),
        compiler_params=pltpu.CompilerParams(
            dimension_semantics=("parallel",),
            vmem_limit_bytes=_VMEM_LIMIT_BYTES,
        ),
        cost_estimate=pl.CostEstimate(
            flops=flops, transcendentals=0, bytes_accessed=bytes_accessed),
    )(patches, params["wb_mat"], params["bb_row"], params["wp_mat"], params["bp_row"])

    # Strip row padding and lane padding, restore (B, num_patches, embed_dim).
    return out_flat[:rows, :embed_dim].reshape(B, num_patches, embed_dim)


if __name__ == "__main__":
    # Small, forward-consistent shapes: B=2, in_chans=4, img 16x16, patch 4
    # -> feature map 4x4 (num_patches=16), feature_dim=32, embed_dim=32.
    B, C, H, W = 2, 4, 16, 16
    patch = 4
    feature_dim = 32
    embed_dim = 32

    key = jax.random.PRNGKey(0)
    k_x, k_wb, k_bb, k_wp, k_bp = jax.random.split(key, 5)

    x = jax.random.normal(k_x, (B, C, H, W), dtype=jnp.float32)
    # backbone: Conv2d(C, feature_dim, kernel=patch, stride=patch) + ReLU
    wb = jax.random.normal(k_wb, (feature_dim, C, patch, patch), jnp.float32) * 0.05
    bb = jax.random.normal(k_bb, (feature_dim,), jnp.float32) * 0.05
    # proj: Conv2d(feature_dim, embed_dim, 1)
    wp = jax.random.normal(k_wp, (embed_dim, feature_dim, 1, 1), jnp.float32) * 0.05
    bp = jax.random.normal(k_bp, (embed_dim,), jnp.float32) * 0.05

    params = prepare_hybrid_embed_params(wb, bb, wp, bp, patch=patch, in_chans=C)
    out = hybrid_embed(x, params)
    out = jax.block_until_ready(out)

    # Pure-JAX f32 reference of the same semantics (backbone conv + relu, 1x1 proj,
    # flatten(2).transpose(1, 2)).  Kernel uses bf16 matmul inputs with f32
    # accumulation, so tolerance is loosened accordingly.
    Hp, Wp_ = H // patch, W // patch
    x_nhwc = jnp.transpose(x, (0, 2, 3, 1)).reshape(B, Hp, patch, Wp_, patch, C)
    x_patches = jnp.transpose(x_nhwc, (0, 1, 3, 2, 4, 5)).reshape(
        B, Hp * Wp_, patch * patch * C)
    wb_mat = jnp.transpose(wb, (2, 3, 1, 0)).reshape(patch * patch * C, feature_dim)
    feat = jnp.maximum(jnp.einsum("bnk,kf->bnf", x_patches, wb_mat) + bb, 0.0)
    ref = jnp.einsum("bnf,fe->bne", feat, wp[:, :, 0, 0].T) + bp

    assert out.shape == (B, Hp * Wp_, embed_dim)
    max_err = float(jnp.max(jnp.abs(out - ref)))
    assert jnp.allclose(out, ref, atol=3e-2, rtol=3e-2), f"max_err={max_err}"
    print("KERNEL_OK")
</pallas_src>

<mosaic_0001>
module attributes {stable_mosaic.version = 11 : i64} {
  func.func @hybrid_embed_kernel(%arg0: i32, %arg1: memref<32x128xbf16, #tpu.memory_space<vmem>>, %arg2: memref<128x128xbf16, #tpu.memory_space<vmem>>, %arg3: memref<1x128xf32, #tpu.memory_space<vmem>>, %arg4: memref<128x128xbf16, #tpu.memory_space<vmem>>, %arg5: memref<1x128xf32, #tpu.memory_space<vmem>>, %arg6: memref<32x128xf32, #tpu.memory_space<vmem>>) attributes {dimension_semantics = [#tpu.dimension_semantics<parallel>], iteration_bounds = array<i64: 1>, scalar_prefetch = 0 : i64, scratch_operands = 0 : i64, tpu.core_type = #tpu.core_type<tc>, window_params = [{transform_indices = @transform_0, window_bounds = array<i64: 32, 128>}, {pipeline_mode = #tpu.pipeline_mode<synchronous>, transform_indices = @transform_1, window_bounds = array<i64: 128, 128>}, {pipeline_mode = #tpu.pipeline_mode<synchronous>, transform_indices = @transform_2, window_bounds = array<i64: 1, 128>}, {pipeline_mode = #tpu.pipeline_mode<synchronous>, transform_indices = @transform_3, window_bounds = array<i64: 128, 128>}, {pipeline_mode = #tpu.pipeline_mode<synchronous>, transform_indices = @transform_4, window_bounds = array<i64: 1, 128>}, {transform_indices = @transform_5, window_bounds = array<i64: 32, 128>}]} {
    %c0 = arith.constant 0 : index
    %c0_0 = arith.constant 0 : index
    %0 = vector.load %arg1[%c0, %c0_0] : memref<32x128xbf16, #tpu.memory_space<vmem>>, vector<32x128xbf16>
    %c0_1 = arith.constant 0 : index
    %c0_2 = arith.constant 0 : index
    %1 = vector.load %arg2[%c0_1, %c0_2] : memref<128x128xbf16, #tpu.memory_space<vmem>>, vector<128x128xbf16>
    %cst = arith.constant dense<0.000000e+00> : vector<32x128xf32>
    %2 = tpu.matmul %0, %1, %cst {dimension_numbers = #tpu.dot_dimension_numbers<[1], [0], [0], [1], [0, 0, 1, 1], [], []>} : vector<32x128xbf16>, vector<128x128xbf16>, vector<32x128xf32> -> vector<32x128xf32>
    %c0_3 = arith.constant 0 : index
    %c0_4 = arith.constant 0 : index
    %3 = vector.load %arg3[%c0_3, %c0_4] : memref<1x128xf32, #tpu.memory_space<vmem>>, vector<1x128xf32>
    %4 = vector.broadcast %3 : vector<1x128xf32> to vector<32x128xf32>
    %5 = arith.addf %2, %4 : vector<32x128xf32>
    %cst_5 = arith.constant 0.000000e+00 : f32
    %6 = vector.broadcast %cst_5 : f32 to vector<32x128xf32>
    %7 = arith.maximumf %5, %6 : vector<32x128xf32>
    %8 = arith.truncf %7 : vector<32x128xf32> to vector<32x128xbf16>
    %c0_6 = arith.constant 0 : index
    %c0_7 = arith.constant 0 : index
    %9 = vector.load %arg4[%c0_6, %c0_7] : memref<128x128xbf16, #tpu.memory_space<vmem>>, vector<128x128xbf16>
    %cst_8 = arith.constant dense<0.000000e+00> : vector<32x128xf32>
    %10 = tpu.matmul %8, %9, %cst_8 {dimension_numbers = #tpu.dot_dimension_numbers<[1], [0], [0], [1], [0, 0, 1, 1], [], []>} : vector<32x128xbf16>, vector<128x128xbf16>, vector<32x128xf32> -> vector<32x128xf32>
    %c0_9 = arith.constant 0 : index
    %c0_10 = arith.constant 0 : index
    %11 = vector.load %arg5[%c0_9, %c0_10] : memref<1x128xf32, #tpu.memory_space<vmem>>, vector<1x128xf32>
    %12 = vector.broadcast %11 : vector<1x128xf32> to vector<32x128xf32>
    %13 = arith.addf %10, %12 : vector<32x128xf32>
    %c0_11 = arith.constant 0 : index
    %c0_12 = arith.constant 0 : index
    %14 = vector.load %arg6[%c0_11, %c0_12] : memref<32x128xf32, #tpu.memory_space<vmem>>, vector<32x128xf32>
    tpu.vector_store %arg6[%c0_11, %c0_12], %13 {strides = array<i32>} : memref<32x128xf32, #tpu.memory_space<vmem>>, vector<32x128xf32>,
    return
  }
  func.func @transform_0(%arg0: i32) -> (i32, i32) {
    %c0_i32 = arith.constant 0 : i32
    %c0_i32_0 = arith.constant 0 : i32
    return %arg0, %c0_i32 : i32, i32
  }
  func.func @transform_1(%arg0: i32) -> (i32, i32) {
    %c0_i32 = arith.constant 0 : i32
    %c0_i32_0 = arith.constant 0 : i32
    %c0_i32_1 = arith.constant 0 : i32
    return %c0_i32, %c0_i32_0 : i32, i32
  }
  func.func @transform_2(%arg0: i32) -> (i32, i32) {
    %c0_i32 = arith.constant 0 : i32
    %c0_i32_0 = arith.constant 0 : i32
    %c0_i32_1 = arith.constant 0 : i32
    return %c0_i32, %c0_i32_0 : i32, i32
  }
  func.func @transform_3(%arg0: i32) -> (i32, i32) {
    %c0_i32 = arith.constant 0 : i32
    %c0_i32_0 = arith.constant 0 : i32
    %c0_i32_1 = arith.constant 0 : i32
    return %c0_i32, %c0_i32_0 : i32, i32
  }
  func.func @transform_4(%arg0: i32) -> (i32, i32) {
    %c0_i32 = arith.constant 0 : i32
    %c0_i32_0 = arith.constant 0 : i32
    %c0_i32_1 = arith.constant 0 : i32
    return %c0_i32, %c0_i32_0 : i32, i32
  }
  func.func @transform_5(%arg0: i32) -> (i32, i32) {
    %c0_i32 = arith.constant 0 : i32
    %c0_i32_0 = arith.constant 0 : i32
    return %arg0, %c0_i32 : i32, i32
  }
}

</mosaic_0001>

<bundles_post_ra>
// kernel: tpu_custom_call.1
= control target key start
LH: loop header
LB: loop body
LE: loop exit
PB: predicated region body
PF: predicated region fallthrough
CT: control target
= control target key end

     0   :  { %10 = vsyncpa [#allocation3], 0  ;;  %s595_s0 = inlined_call_operand.hbm [shape: bf16[32,128], index: 0, kind: input, shape index: {}]   ;;  %s596_s1 = inlined_call_operand.hbm [shape: bf16[128,128], index: 1, kind: input, shape index: {}]   ;;  %s597_s2 = inlined_call_operand.vmem [shape: f32[1,128], index: 2, kind: input, shape index: {}]   ;;  %s598_s3 = inlined_call_operand.hbm [shape: bf16[128,128], index: 3, kind: input, shape index: {}]   ;;  %s599_s4 = inlined_call_operand.vmem [shape: f32[1,128], index: 4, kind: input, shape index: {}]   ;;  %s600_s5 = inlined_call_operand.hbm [shape: f32[32,128], index: 5, kind: output, shape index: {}]  }
   0x1   :  { %11 = vsyncpa [#allocation6], 0 }
   0x2   :  { %12 = vsyncpa [#allocation4], 0  ;;  %s539_s18 = smov [#allocation5]   ;;  %s540_s20 = smov [#allocation2]  }
   0x3   :  { %s30_s19 = sshll.u32 %s539_s18, 4  ;;  %s18_s21 = sshll.u32 %s540_s20, 4  ;;  %s31_s19 = int_to_ptr.vmem [resolvable:$true] %s30_s19  ;;  %s19_s21 = int_to_ptr.vmem [resolvable:$true] %s18_s21 }
   0x4   :  { %s461_s22 = scalar_lea.vmem %s31_s19, 1024  ;;  %p466_p1 = scmp.lt.s32.totalorder %s31_s19, %s31_s19 }
   0x5   :  { %p462_p0 = scmp.ne.s32.totalorder %s31_s19, %s461_s22  ;;  %p467_p2 = scmp.lt.s32.totalorder %s461_s22, %s461_s22 }
   0x7   :  { %p468_p3 = por %p467_p2, %p466_p1 }
   0x9   :  { %p469_p4 = pnand %p468_p3, %p462_p0 }
   0xb   :  { %472 = shalt.err (!%p469_p4)
}
   0xc   :  { %s541_s23 = smov 64   ;;  %s542_s24 = smov 4  }
   0xd   :  { %36 = dma.hbm_to_vmem [thread:$0]  %s596_s1, 1024, %s31_s19, [#allocation6], %s541_s23, %s541_s23, %s542_s24  }
   0xe   :  { %s481_s27 = scalar_lea.vmem %s19_s21, 256  ;;  %p486_p6 = scmp.lt.s32.totalorder %s19_s21, %s19_s21 }
   0xf   :  { %p482_p5 = scmp.ne.s32.totalorder %s19_s21, %s481_s27  ;;  %p487_p7 = scmp.lt.s32.totalorder %s481_s27, %s481_s27 }
  0x11   :  { %p488_p8 = por %p487_p7, %p486_p6 }
  0x13   :  { %p489_p9 = pnand %p488_p8, %p482_p5 }
  0x15   :  { %492 = shalt.err (!%p489_p9)
}
  0x16   :  { %24 = dma.hbm_to_vmem [thread:$0]  %s595_s0, 256, %s19_s21, [#allocation3], %s541_s23, %s541_s23, %s542_s24  }
  0x17   :  { %s543_s30 = smov [#allocation7]  }
  0x18   :  { %s44_s6 = sshll.u32 %s543_s30, 4  ;;  %s45_s6 = int_to_ptr.vmem [resolvable:$true] %s44_s6 }
  0x19   :  { %s501_s7 = scalar_lea.vmem %s45_s6, 1024  ;;  %p506_p11 = scmp.lt.s32.totalorder %s45_s6, %s45_s6 }
  0x1a   :  { %p502_p10 = scmp.ne.s32.totalorder %s45_s6, %s501_s7  ;;  %p507_p12 = scmp.lt.s32.totalorder %s501_s7, %s501_s7 }
  0x1c   :  { %p508_p13 = por %p507_p12, %p506_p11 }
  0x1e   :  { %p509_p0 = pnand %p508_p13, %p502_p10 }
  0x20   :  { %512 = shalt.err (!%p509_p0)
}
  0x21   :  { %50 = dma.hbm_to_vmem [thread:$0]  %s598_s3, 1024, %s45_s6, [#allocation6], %s541_s23, %s541_s23, %s542_s24  }
  0x22   :  { %533 = dma.done.wait [#allocation3], 256  }
  0x23   :  { %534 = vsyncadd [#allocation3], 4294967040 }
  0x24   :  { %535 = dma.done.wait [#allocation6], 2048  }
  0x25   :  { %536 = vsyncadd [#allocation6], 4294965248  ;;  %v435_v0 = vld [vmem:[#allocation5 + $0x38] sm:$0xff]   ;;  %v436_v1 = vld [vmem:[#allocation5 + $0x30] sm:$0xff]  }
  0x26   :  { %387 = vmatprep.subr.bf16.mxu0 %v435_v0  ;;  %v437_v2 = vld [vmem:[#allocation5 + $0x28] sm:$0xff]   ;;  %v438_v3 = vld [vmem:[#allocation5 + $0x20] sm:$0xff]   ;;  %v443_v4 = vld [vmem:[#allocation2] sm:$0xff]  }
  0x27   :  { %388 = vmatpush3.bf16.msra.mxu0 %v435_v0  ;;  %403 = vmatprep.mubr.bf16.mxu0 %v443_v4  ;;  %v445_v5 = vld [vmem:[#allocation7 + $0x38] sm:$0xff]   ;;  %v446_v6 = vld [vmem:[#allocation7 + $0x30] sm:$0xff]   ;;  %v447_v9 = vld [vmem:[#allocation7 + $0x28] sm:$0xff]  }
  0x28   :  { %389 = vmatprep.subr.bf16.mxu0 %v436_v1  ;;  %v439_v7 = vld [vmem:[#allocation5 + $0x18] sm:$0xff]   ;;  %407 = vmatprep.subr.bf16.mxu1 %v445_v5  ;;  %v440_v8 = vld [vmem:[#allocation5 + $0x10] sm:$0xff]   ;;  %v448_v10 = vld [vmem:[#allocation7 + $0x20] sm:$0xff]  }
  0x29   :  { %408 = vmatpush3.bf16.msra.mxu1 %v445_v5  ;;  %v441_v11 = vld [vmem:[#allocation5 + $0x8] sm:$0xff]   ;;  %v449_v12 = vld [vmem:[#allocation7 + $0x18] sm:$0xff]   ;;  %v442_v13 = vld [vmem:[#allocation5] sm:$0xff]  }
  0x2a   :  { %409 = vmatprep.subr.bf16.mxu1 %v446_v6  ;;  %v444_v14 = vld [vmem:[#allocation2 + $0x8] sm:$0xff]   ;;  %v450_v15 = vld [vmem:[#allocation7 + $0x10] sm:$0xff]   ;;  %v451_v16 = vld [vmem:[#allocation7 + $0x8] sm:$0xff]  }
  0x2b   :  { %390 = vmatpush3.bf16.msra.mxu0 %v436_v1  ;;  %v452_v17 = vld [vmem:[#allocation7] sm:$0xff]   ;;  %v347_v20 = vld [vmem:[%s597_s2] ss:$0 sm:$0xff]  ;;  %s544_s2 = smov [#allocation8]  }
  0x2c   :  { %391 = vmatprep.subr.bf16.mxu0 %v437_v2  ;;  %v358_v33 = vld [vmem:[%s599_s4] ss:$0 sm:$0xff]  ;;  %s334_s11 = sshll.u32 %s544_s2, 4  ;;  %s335_s11 = int_to_ptr.vmem [resolvable:$true] %s334_s11 }
  0x2d   :  { %410 = vmatpush3.bf16.msra.mxu1 %v446_v6  ;;  %s513_s12 = scalar_lea.vmem %s335_s11, 512  ;;  %p518_p2 = scmp.lt.s32.totalorder %s335_s11, %s335_s11 }
  0x2e   :  { %411 = vmatprep.subr.bf16.mxu1 %v447_v9  ;;  %p514_p1 = scmp.ne.s32.totalorder %s335_s11, %s513_s12  ;;  %p519_p3 = scmp.lt.s32.totalorder %s513_s12, %s513_s12 }
  0x2f   :  { %392 = vmatpush3.bf16.msra.mxu0 %v437_v2 }
  0x30   :  { %393 = vmatprep.subr.bf16.mxu0 %v438_v3  ;;  %p520_p4 = por %p519_p3, %p518_p2 }
  0x31   :  { %412 = vmatpush3.bf16.msra.mxu1 %v447_v9 }
  0x32   :  { %413 = vmatprep.subr.bf16.mxu1 %v448_v10  ;;  %p521_p5 = pnand %p520_p4, %p514_p1 }
  0x33   :  { %394 = vmatpush3.bf16.msra.mxu0 %v438_v3 }
  0x34   :  { %395 = vmatprep.subr.bf16.mxu0 %v439_v7 }
  0x35   :  { %414 = vmatpush3.bf16.msra.mxu1 %v448_v10 }
  0x36   :  { %415 = vmatprep.subr.bf16.mxu1 %v449_v12 }
  0x37   :  { %396 = vmatpush3.bf16.msra.mxu0 %v439_v7 }
  0x38   :  { %397 = vmatprep.subr.bf16.mxu0 %v440_v8 }
  0x39   :  { %416 = vmatpush3.bf16.msra.mxu1 %v449_v12 }
  0x3a   :  { %417 = vmatprep.subr.bf16.mxu1 %v450_v15 }
  0x3b   :  { %398 = vmatpush3.bf16.msra.mxu0 %v440_v8 }
  0x3c   :  { %399 = vmatprep.subr.bf16.mxu0 %v441_v11 }
  0x3d   :  { %418 = vmatpush3.bf16.msra.mxu1 %v450_v15 }
  0x3e   :  { %419 = vmatprep.subr.bf16.mxu1 %v451_v16 }
  0x3f   :  { %400 = vmatpush3.bf16.msra.mxu0 %v441_v11 }
  0x40   :  { %401 = vmatprep.subr.bf16.mxu0 %v442_v13 }
  0x41   :  { %420 = vmatpush3.bf16.msra.mxu1 %v451_v16 }
  0x42   :  { %421 = vmatprep.subr.bf16.mxu1 %v452_v17 }
  0x43   :  { %402 = vmatpush3.bf16.msra.mxu0 %v442_v13 }
  0x45   :  { %422 = vmatpush3.bf16.msra.mxu1 %v452_v17 }
  0x46   :  { %404 = vmatmul.mubr.bf16.vlgmr.msra.gmra.mxu0 %v444_v14 }
 0x106   :  { %v405_v18 = vpop.f32.mrf.mxu0 }
 0x107   :  { %v193_v24 = vadd.f32 %v405_v18, %v347_v20 }
 0x108   :  { %v184_v19 = vpop.f32.mrf.mxu0 }
 0x109   :  { %v185_v22 = vadd.f32 %v347_v20, %v184_v19  ;;  %v201_v30 = vmax.f32 %v193_v24, 0.0 }
 0x10a   :  { %v406_v21 = vpop.f32.mrf.mxu0 }
 0x10b   :  { %v196_v23 = vadd.f32 %v406_v21, %v347_v20  ;;  %v199_v28 = vmax.f32 %v185_v22, 0.0 }
 0x10c   :  { %v187_v25 = vpop.f32.mrf.mxu0 }
 0x10d   :  { %v188_v26 = vadd.f32 %v347_v20, %v187_v25  ;;  %v202_v27 = vmax.f32 %v196_v23, 0.0 }
 0x10f   :  { %v200_v29 = vmax.f32 %v188_v26, 0.0  ;;  %v204_v32 = vpack.c.bf16 %v202_v27, %v201_v30 }
 0x111   :  { %v203_v31 = vpack.c.bf16 %v200_v29, %v199_v28 }
 0x113   :  { %423 = vmatprep.mubr.bf16.mxu1 %v203_v31 }
 0x114   :  { %424 = vmatmul.mubr.bf16.vlgmr.msra.gmra.mxu1 %v204_v32 }
 0x1d4   :  { %v425_v34 = vpop.f32.mrf.mxu1 }
 0x1d5   :  { %v319_v35 = vadd.f32 %v425_v34, %v358_v33 }
 0x1d6   :  { %v310_v36 = vpop.f32.mrf.mxu1 }
 0x1d7   :  { %327 = vst [vmem:[#allocation8 + $0x10] sm:$0xff] %v319_v35  ;;  %v311_v37 = vadd.f32 %v358_v33, %v310_v36 }
 0x1d8   :  { %v426_v38 = vpop.f32.mrf.mxu1 }
 0x1d9   :  { %325 = vst [vmem:[#allocation8] sm:$0xff] %v311_v37  ;;  %v322_v39 = vadd.f32 %v426_v38, %v358_v33 }
 0x1da   :  { %v313_v40 = vpop.f32.mrf.mxu1 }
 0x1db   :  { %328 = vst [vmem:[#allocation8 + $0x18] sm:$0xff] %v322_v39  ;;  %v314_v41 = vadd.f32 %v358_v33, %v313_v40 }
 0x1dd   :  { %326 = vst [vmem:[#allocation8 + $0x8] sm:$0xff] %v314_v41 }
 0x1de   :  { %524 = shalt.err (!%p521_p5)
}
 0x1df   :  { %s545_s4 = smov 128   ;;  %s546_s13 = smov 8  }
 0x1e0   :  { %340 = dma.vmem_to_hbm [thread:$0]  %s335_s11, 512, %s600_s5, [#allocation4], %s545_s4, %s545_s4, %s546_s13  }
 0x1e1   :  { %537 = dma.done.wait [#allocation4], 512  }
 0x1e2   :  { %538 = vsyncadd [#allocation4], 4294966784 }
 0x1e3   :  { %344 = vsyncpa [#allocation3], 1 }
 0x1e4   :  { %345 = vsyncpa [#allocation6], 1 }
 0x1e5   :  { %346 = vsyncpa [#allocation4], 1 }

</bundles_post_ra>
